<compile_context>
chip_gen: v7x
topology: tpu7x:2x2x1
jax: 0.10.0
libtpu: 0.0.40
codegen_flags: <defaults>
</compile_context>

<pallas_src>
import math
import functools

import jax
import jax.numpy as jnp
from jax import lax
from jax.experimental import pallas as pl
from jax.experimental.pallas import tpu as pltpu

EPS = 1e-5  # PyTorch LayerNorm default eps


def _layernorm_rows(v, g, b):
    """LayerNorm over the last dim; g/b are (1, F) row vectors."""
    mu = jnp.mean(v, axis=-1, keepdims=True)
    var = jnp.mean((v - mu) ** 2, axis=-1, keepdims=True)
    return (v - mu) * lax.rsqrt(var + EPS) * g + b


def _full_spec(arr):
    nd = arr.ndim
    return pl.BlockSpec(arr.shape, lambda *args, _nd=nd: (0,) * _nd)


def _vmem_capacity_bytes():
    """Physical VMEM of the attached TPU; conservative (v7x, 64 MiB) fallback."""
    try:
        if jax.devices()[0].platform == "tpu":
            return int(pltpu.get_tpu_info().vmem_capacity_bytes)
    except Exception:
        pass
    return 64 * 1024 * 1024


def _pick_edge_tile(nn, e, h, budget_bytes=8 * 1024 * 1024):
    """Lane tile T for the flattened N*N edge dim (lane-dense layout)."""
    if nn % 128 != 0:
        # Full last dim is always a legal block; the lane-dense layout keeps even a
        # full-NN tile at only O((E + 2E + H) * NN) floats.
        return nn
    rows = 4 * e + 2 * h + 8                       # ln/in, hidden, out (+slack), f32
    cap = (budget_bytes // (2 * 4 * rows)) // 128 * 128   # double-buffered f32
    cap = max(128, min(cap, 64 * 1024, nn))
    for t in range(cap, 127, -128):
        if nn % t == 0:
            return t
    return 128


def _pick_tb(b, n, fin, fout, h, budget_bytes):
    """Largest divisor of B (<=8) whose per-step footprint (incl. in-kernel f32
    temporaries) fits the budget, keeping >= 2 grid steps for the v7x megacore."""
    f32 = 4
    io_b = 2 * f32 * (n * fin + n * n + h * n * n + n * fout)        # double-buffered blocks
    tmp_b = f32 * (3 * n * fout          # qkv
                   + 3 * n * fout        # q/k/v views
                   + 3 * h * n * n       # scores / probs / masked copies
                   + 2 * n * fout        # ctx, h_attn
                   + 2 * n * 2 * fout)   # FFN hidden (+slack)
    per_b = io_b + tmp_b
    tb = 1
    for cand in range(1, min(b, 8) + 1):
        if b % cand:
            continue
        if b >= 2 and b // cand < 2:     # keep >= 2 grid steps (v7x has 2 TensorCores)
            continue
        if cand * per_b <= budget_bytes:
            tb = cand
    return tb


# ---------------------------------------------------------------------------
# Kernel 1: lane-dense edge MLP  (LayerNorm -> Linear -> ReLU -> Linear -> tanh*5)
# Input tile (1, E, T): E feature rows on sublanes, T = flattened N*N on lanes.
# Output written directly as (1, H, T)  =>  final array (B, H, N*N), no transpose.
# ---------------------------------------------------------------------------
def _edge_mlp_kernel(ea_ref, g_ref, b_ref, w1t_ref, b1_ref, w2t_ref, b2_ref, out_ref):
    e = ea_ref[0].astype(jnp.float32)                                 # (E, T)
    mu = jnp.mean(e, axis=0, keepdims=True)                           # (1, T)
    var = jnp.mean((e - mu) ** 2, axis=0, keepdims=True)
    e = (e - mu) * lax.rsqrt(var + EPS) * g_ref[...] + b_ref[...]     # LN over E rows
    hid = jnp.dot(w1t_ref[...], e,
                  preferred_element_type=jnp.float32) + b1_ref[...]   # (2E, T)
    hid = jnp.maximum(hid, 0.0)                                       # ReLU
    # TODO(synk): mlp_dropout is identity (eval mode)
    eb = jnp.dot(w2t_ref[...], hid,
                 preferred_element_type=jnp.float32) + b2_ref[...]    # (H, T)
    out_ref[0] = jnp.tanh(eb) * 5.0                                   # fused tanh*5 epilogue


# ---------------------------------------------------------------------------
# Kernel 2: fused GAT (packed QKV projection + batched attention + FFN),
# TB batch elements per grid step.
# ---------------------------------------------------------------------------
def _gat_kernel(num_heads, dh,
                x_ref, adj_ref, ebias_ref,
                ln1_g, ln1_b, wp, bp, wqkv,
                ln2_g, ln2_b, fw1, fb1, fw2, fb2,
                out_ref):
    TB, N, Fin = x_ref.shape
    H = num_heads
    Fout = H * dh
    neg_inf = float(jnp.finfo(jnp.float32).min)
    scale = 1.0 / math.sqrt(dh)

    # ---- node projection + packed QKV over TB*N rows (wide MXU matmuls) ----
    x = x_ref[...].reshape(TB * N, Fin)
    hx = _layernorm_rows(x, ln1_g[...], ln1_b[...])
    xp = jnp.dot(hx, wp[...], preferred_element_type=jnp.float32) + bp[...]    # (TB*N, F)
    qkv = jnp.dot(xp, wqkv[...], preferred_element_type=jnp.float32)           # (TB*N, 3F)
    q = qkv[:, :Fout].reshape(TB, N, H, dh)
    k = qkv[:, Fout:2 * Fout].reshape(TB, N, H, dh)
    v = qkv[:, 2 * Fout:].reshape(TB, N, H, dh)

    # ---- batched attention (no per-batch unroll, no concatenate, no .T) ----
    s = jnp.einsum("bnhd,bmhd->bhnm", q, k,
                   preferred_element_type=jnp.float32) * scale                 # (TB,H,N,N)
    s = s + ebias_ref[...]                      # edge bias (tanh*5 fused in kernel 1)
    s = jnp.where(s >= 0.0, s, 0.2 * s)         # LeakyReLU(0.2)

    ri = lax.broadcasted_iota(jnp.int32, (N, N), 0)
    ci = lax.broadcasted_iota(jnp.int32, (N, N), 1)
    eye = (ri == ci).astype(jnp.float32)
    mask = jnp.minimum(adj_ref[...] + eye[None], 1.0)                          # (TB, N, N)
    all_masked = jnp.max(mask, axis=-1, keepdims=True) == 0.0                  # (TB, N, 1)
    s = jnp.where(mask[:, None] == 0.0, neg_inf, s)
    s = jnp.where(all_masked[:, None], 0.0, s)  # fully-masked rows -> uniform probs
    s = s - jnp.max(s, axis=-1, keepdims=True)
    p = jnp.exp(s)
    p = p * pl.reciprocal(jnp.sum(p, axis=-1, keepdims=True), approx=True)
    # (probs are always finite here -> no isnan pass needed)
    # TODO(synk): attn_dropout / output_dropout are identity (eval mode)
    # TODO(synk): for large N, add a KV-block grid axis with online softmax so the
    # (H, N, N) scores/probs/ebias are never fully VMEM-resident (v7x: 64 MiB).

    ctx = jnp.einsum("bhnm,bmhd->bnhd", p, v,
                     preferred_element_type=jnp.float32).reshape(TB * N, Fout)

    # ---- residual + FFN (packed over TB*N rows) ----
    h_attn = xp + ctx
    g = _layernorm_rows(h_attn, ln2_g[...], ln2_b[...])
    f = jnp.maximum(jnp.dot(g, fw1[...],
                            preferred_element_type=jnp.float32) + fb1[...], 0.0)
    f = jnp.dot(f, fw2[...], preferred_element_type=jnp.float32) + fb2[...]
    out_ref[...] = (h_attn + f).reshape(TB, N, Fout)


# ---------------------------------------------------------------------------
# Wrapper
# ---------------------------------------------------------------------------
def graph_attention_layer(x, adj, edge_attr, params, num_heads):
    B, N, Fin = x.shape
    Fout = params["wp"].shape[1]
    assert Fout % num_heads == 0
    dh = Fout // num_heads
    E = edge_attr.shape[-1]
    H = num_heads
    NN = N * N
    f32 = jnp.float32

    vmem_cap = _vmem_capacity_bytes()
    vmem_limit = min(int(vmem_cap * 0.75), 100 * 1024 * 1024)

    # TODO(synk): edge_attr=None / num_edge_features==0 path not implemented.

    # ---- Kernel 1: lane-dense edge MLP; output (B, H, N*N) f32, tanh*5 fused ----
    # One fused XLA transpose puts N*N on lanes for the whole edge pipeline.
    # TODO(synk): cast this transposed copy to bf16 for HBM-bound deployments
    # (kept f32 here so the edge-bias path stays bit-comparable to the reference).
    ea_t = edge_attr.reshape(B, NN, E).transpose(0, 2, 1)            # (B, E, N*N)
    eln_g = params["eln_g"].reshape(E, 1)
    eln_b = params["eln_b"].reshape(E, 1)
    ew1_t = params["ew1"].T                                          # (2E, E)
    eb1_c = params["eb1"].reshape(2 * E, 1)
    ew2_t = params["ew2"].T                                          # (H, 2E)
    eb2_c = params["eb2"].reshape(H, 1)

    T = _pick_edge_tile(NN, E, H)
    eb_out = pl.pallas_call(
        _edge_mlp_kernel,
        out_shape=jax.ShapeDtypeStruct((B, H, NN), f32),
        grid=(B, NN // T),
        in_specs=[
            pl.BlockSpec((1, E, T), lambda b, t: (b, 0, t)),
            _full_spec(eln_g), _full_spec(eln_b),
            _full_spec(ew1_t), _full_spec(eb1_c),
            _full_spec(ew2_t), _full_spec(eb2_c),
        ],
        out_specs=pl.BlockSpec((1, H, T), lambda b, t: (b, 0, t)),
        compiler_params=pltpu.CompilerParams(
            dimension_semantics=("parallel", "parallel"),
            vmem_limit_bytes=vmem_limit),
    )(ea_t, eln_g, eln_b, ew1_t, eb1_c, ew2_t, eb2_c)
    ebias = eb_out.reshape(B, H, N, N)            # free metadata reshape, no transpose

    # ---- Kernel 2: fused GAT, TB batch elements per grid step ----
    wqkv = jnp.concatenate([params["wq"], params["wk"], params["wv"]], axis=1)  # (F, 3F)
    weights = [params["ln1_g"], params["ln1_b"], params["wp"], params["bp"], wqkv,
               params["ln2_g"], params["ln2_b"],
               params["fw1"], params["fb1"], params["fw2"], params["fb2"]]
    weight_bytes = sum(int(w.size) * 4 for w in weights)

    budget = max(int(vmem_cap * 0.5) - 2 * weight_bytes, 2 * 1024 * 1024)
    TB = _pick_tb(B, N, Fin, Fout, H, budget)

    kernel = functools.partial(_gat_kernel, H, dh)
    out = pl.pallas_call(
        kernel,
        out_shape=jax.ShapeDtypeStruct((B, N, Fout), f32),
        grid=(B // TB,),
        in_specs=[
            pl.BlockSpec((TB, N, Fin), lambda i: (i, 0, 0)),
            pl.BlockSpec((TB, N, N), lambda i: (i, 0, 0)),
            pl.BlockSpec((TB, H, N, N), lambda i: (i, 0, 0, 0)),
        ] + [_full_spec(w) for w in weights],
        # TODO(synk): mark the constant weight specs single-buffered
        # (pipeline_mode=pl.Buffered(1)); they are never re-fetched but default
        # double-buffering allocates 2x their VMEM at large Fout.
        out_specs=pl.BlockSpec((TB, N, Fout), lambda i: (i, 0, 0)),
        compiler_params=pltpu.CompilerParams(
            dimension_semantics=("parallel",),
            vmem_limit_bytes=vmem_limit),
    )(x, adj, ebias, *weights)
    return out


# ---------------------------------------------------------------------------
# Pure-JAX f32 reference (mirrors the PyTorch forward, eval mode)
# ---------------------------------------------------------------------------
def reference_forward(x, adj, edge_attr, p, num_heads):
    B, N, _ = x.shape
    Fout = p["wp"].shape[1]
    dh = Fout // num_heads

    def ln(v, g, b):
        mu = v.mean(-1, keepdims=True)
        var = ((v - mu) ** 2).mean(-1, keepdims=True)
        return (v - mu) / jnp.sqrt(var + EPS) * g[0] + b[0]

    xp = ln(x, p["ln1_g"], p["ln1_b"]) @ p["wp"] + p["bp"][0]
    Q = (xp @ p["wq"]).reshape(B, N, num_heads, dh).transpose(0, 2, 1, 3)
    K = (xp @ p["wk"]).reshape(B, N, num_heads, dh).transpose(0, 2, 1, 3)
    V = (xp @ p["wv"]).reshape(B, N, num_heads, dh).transpose(0, 2, 1, 3)
    s = jnp.einsum("bhnd,bhmd->bhnm", Q, K) / math.sqrt(dh)

    e = ln(edge_attr, p["eln_g"], p["eln_b"])
    eb = jnp.maximum(e @ p["ew1"] + p["eb1"][0], 0.0) @ p["ew2"] + p["eb2"][0]
    s = s + jnp.tanh(eb.transpose(0, 3, 1, 2)) * 5.0
    s = jnp.where(s >= 0, s, 0.2 * s)

    eye = jnp.eye(N, dtype=x.dtype)
    mask = jnp.minimum(adj + eye, 1.0)[:, None]
    neg_inf = float(jnp.finfo(jnp.float32).min)
    s = jnp.where(mask == 0, neg_inf, s)
    all_masked = jnp.all(mask == 0, axis=-1, keepdims=True)
    s = jnp.where(all_masked, 0.0, s)
    s = s - s.max(-1, keepdims=True)
    pr = jnp.exp(s)
    pr = pr / pr.sum(-1, keepdims=True)
    pr = jnp.nan_to_num(pr, nan=0.0)
    ctx = jnp.einsum("bhnm,bhmd->bhnd", pr, V).transpose(0, 2, 1, 3).reshape(B, N, Fout)
    h_attn = xp + ctx
    g = ln(h_attn, p["ln2_g"], p["ln2_b"])
    f = jnp.maximum(g @ p["fw1"] + p["fb1"][0], 0.0) @ p["fw2"] + p["fb2"][0]
    return h_attn + f


if __name__ == "__main__":
    B, N = 2, 8
    Fin, Fout = 16, 32
    E, H = 4, 2

    key = jax.random.PRNGKey(0)
    ks = jax.random.split(key, 24)
    w = lambda k, shape, s=0.1: s * jax.random.normal(k, shape, jnp.float32)

    params = dict(
        ln1_g=1.0 + w(ks[0], (1, Fin)), ln1_b=w(ks[1], (1, Fin)),
        wp=w(ks[2], (Fin, Fout)), bp=w(ks[3], (1, Fout)),
        wq=w(ks[4], (Fout, Fout)), wk=w(ks[5], (Fout, Fout)), wv=w(ks[6], (Fout, Fout)),
        eln_g=1.0 + w(ks[7], (1, E)), eln_b=w(ks[8], (1, E)),
        ew1=w(ks[9], (E, 2 * E)), eb1=w(ks[10], (1, 2 * E)),
        ew2=w(ks[11], (2 * E, H)), eb2=w(ks[12], (1, H)),
        ln2_g=1.0 + w(ks[13], (1, Fout)), ln2_b=w(ks[14], (1, Fout)),
        fw1=w(ks[15], (Fout, 2 * Fout)), fb1=w(ks[16], (1, 2 * Fout)),
        fw2=w(ks[17], (2 * Fout, Fout)), fb2=w(ks[18], (1, Fout)),
    )

    x = jax.random.normal(ks[19], (B, N, Fin), jnp.float32)
    adj = (jax.random.uniform(ks[20], (B, N, N)) < 0.5).astype(jnp.float32)
    edge_attr = jax.random.normal(ks[21], (B, N, N, E), jnp.float32)

    out = graph_attention_layer(x, adj, edge_attr, params, num_heads=H)
    out = jax.block_until_ready(out)

    ref = reference_forward(x, adj, edge_attr, params, num_heads=H)
    assert out.shape == (B, N, Fout)
    assert not bool(jnp.any(jnp.isnan(out)))
    # f32 matmuls; only the approx reciprocal in the softmax deviates from the reference
    assert bool(jnp.allclose(out, ref, rtol=2e-2, atol=2e-2)), "mismatch vs JAX reference"

    print("KERNEL_OK")
</pallas_src>

<mosaic_0001>
module attributes {stable_mosaic.version = 11 : i64} {
  func.func @_edge_mlp_kernel(%arg0: i32, %arg1: i32, %arg2: memref<1x4x64xf32, #tpu.memory_space<vmem>>, %arg3: memref<4x1xf32, #tpu.memory_space<vmem>>, %arg4: memref<4x1xf32, #tpu.memory_space<vmem>>, %arg5: memref<8x4xf32, #tpu.memory_space<vmem>>, %arg6: memref<8x1xf32, #tpu.memory_space<vmem>>, %arg7: memref<2x8xf32, #tpu.memory_space<vmem>>, %arg8: memref<2x1xf32, #tpu.memory_space<vmem>>, %arg9: memref<1x2x64xf32, #tpu.memory_space<vmem>>) attributes {dimension_semantics = [#tpu.dimension_semantics<parallel>, #tpu.dimension_semantics<parallel>], iteration_bounds = array<i64: 2, 1>, scalar_prefetch = 0 : i64, scratch_operands = 0 : i64, tpu.core_type = #tpu.core_type<tc>, window_params = [{transform_indices = @transform_0, window_bounds = array<i64: 1, 4, 64>}, {pipeline_mode = #tpu.pipeline_mode<synchronous>, transform_indices = @transform_1, window_bounds = array<i64: 4, 1>}, {pipeline_mode = #tpu.pipeline_mode<synchronous>, transform_indices = @transform_2, window_bounds = array<i64: 4, 1>}, {pipeline_mode = #tpu.pipeline_mode<synchronous>, transform_indices = @transform_3, window_bounds = array<i64: 8, 4>}, {pipeline_mode = #tpu.pipeline_mode<synchronous>, transform_indices = @transform_4, window_bounds = array<i64: 8, 1>}, {pipeline_mode = #tpu.pipeline_mode<synchronous>, transform_indices = @transform_5, window_bounds = array<i64: 2, 8>}, {pipeline_mode = #tpu.pipeline_mode<synchronous>, transform_indices = @transform_6, window_bounds = array<i64: 2, 1>}, {transform_indices = @transform_7, window_bounds = array<i64: 1, 2, 64>}]} {
    %c0 = arith.constant 0 : index
    %c0_0 = arith.constant 0 : index
    %c0_1 = arith.constant 0 : index
    %0 = vector.load %arg2[%c0, %c0_0, %c0_1] : memref<1x4x64xf32, #tpu.memory_space<vmem>>, vector<1x4x64xf32>
    %1 = vector.shape_cast %0 : vector<1x4x64xf32> to vector<4x64xf32>
    %cst = arith.constant dense<0.000000e+00> : vector<64xf32>
    %2 = vector.multi_reduction <add>, %1, %cst [0] : vector<4x64xf32> to vector<64xf32>
    %3 = vector.shape_cast %2 : vector<64xf32> to vector<1x64xf32>
    %cst_2 = arith.constant 4.000000e+00 : f32
    %4 = vector.broadcast %cst_2 : f32 to vector<1x64xf32>
    %5 = arith.divf %3, %4 : vector<1x64xf32>
    %6 = vector.broadcast %5 : vector<1x64xf32> to vector<4x64xf32>
    %7 = arith.subf %1, %6 : vector<4x64xf32>
    %8 = arith.mulf %7, %7 : vector<4x64xf32>
    %cst_3 = arith.constant dense<0.000000e+00> : vector<64xf32>
    %9 = vector.multi_reduction <add>, %8, %cst_3 [0] : vector<4x64xf32> to vector<64xf32>
    %10 = vector.shape_cast %9 : vector<64xf32> to vector<1x64xf32>
    %cst_4 = arith.constant 4.000000e+00 : f32
    %11 = vector.broadcast %cst_4 : f32 to vector<1x64xf32>
    %12 = arith.divf %10, %11 : vector<1x64xf32>
    %13 = vector.broadcast %5 : vector<1x64xf32> to vector<4x64xf32>
    %14 = arith.subf %1, %13 : vector<4x64xf32>
    %cst_5 = arith.constant 9.99999974E-6 : f32
    %15 = vector.broadcast %cst_5 : f32 to vector<1x64xf32>
    %16 = arith.addf %12, %15 : vector<1x64xf32>
    %17 = math.rsqrt %16 : vector<1x64xf32>
    %18 = vector.broadcast %17 : vector<1x64xf32> to vector<4x64xf32>
    %19 = arith.mulf %14, %18 : vector<4x64xf32>
    %c0_6 = arith.constant 0 : index
    %c0_7 = arith.constant 0 : index
    %20 = vector.load %arg3[%c0_6, %c0_7] : memref<4x1xf32, #tpu.memory_space<vmem>>, vector<4x1xf32>
    %21 = vector.broadcast %20 : vector<4x1xf32> to vector<4x64xf32>
    %22 = arith.mulf %19, %21 : vector<4x64xf32>
    %c0_8 = arith.constant 0 : index
    %c0_9 = arith.constant 0 : index
    %23 = vector.load %arg4[%c0_8, %c0_9] : memref<4x1xf32, #tpu.memory_space<vmem>>, vector<4x1xf32>
    %24 = vector.broadcast %23 : vector<4x1xf32> to vector<4x64xf32>
    %25 = arith.addf %22, %24 : vector<4x64xf32>
    %c0_10 = arith.constant 0 : index
    %c0_11 = arith.constant 0 : index
    %26 = vector.load %arg5[%c0_10, %c0_11] : memref<8x4xf32, #tpu.memory_space<vmem>>, vector<8x4xf32>
    %cst_12 = arith.constant dense<0.000000e+00> : vector<8x64xf32>
    %27 = tpu.matmul %26, %25, %cst_12 {dimension_numbers = #tpu.dot_dimension_numbers<[1], [0], [0], [1], [0, 0, 1, 1], [], []>} : vector<8x4xf32>, vector<4x64xf32>, vector<8x64xf32> -> vector<8x64xf32>
    %c0_13 = arith.constant 0 : index
    %c0_14 = arith.constant 0 : index
    %28 = vector.load %arg6[%c0_13, %c0_14] : memref<8x1xf32, #tpu.memory_space<vmem>>, vector<8x1xf32>
    %29 = vector.broadcast %28 : vector<8x1xf32> to vector<8x64xf32>
    %30 = arith.addf %27, %29 : vector<8x64xf32>
    %cst_15 = arith.constant 0.000000e+00 : f32
    %31 = vector.broadcast %cst_15 : f32 to vector<8x64xf32>
    %32 = arith.maximumf %30, %31 : vector<8x64xf32>
    %c0_16 = arith.constant 0 : index
    %c0_17 = arith.constant 0 : index
    %33 = vector.load %arg7[%c0_16, %c0_17] : memref<2x8xf32, #tpu.memory_space<vmem>>, vector<2x8xf32>
    %cst_18 = arith.constant dense<0.000000e+00> : vector<2x64xf32>
    %34 = tpu.matmul %33, %32, %cst_18 {dimension_numbers = #tpu.dot_dimension_numbers<[1], [0], [0], [1], [0, 0, 1, 1], [], []>} : vector<2x8xf32>, vector<8x64xf32>, vector<2x64xf32> -> vector<2x64xf32>
    %c0_19 = arith.constant 0 : index
    %c0_20 = arith.constant 0 : index
    %35 = vector.load %arg8[%c0_19, %c0_20] : memref<2x1xf32, #tpu.memory_space<vmem>>, vector<2x1xf32>
    %36 = vector.broadcast %35 : vector<2x1xf32> to vector<2x64xf32>
    %37 = arith.addf %34, %36 : vector<2x64xf32>
    %38 = math.tanh %37 : vector<2x64xf32>
    %cst_21 = arith.constant 5.000000e+00 : f32
    %39 = vector.broadcast %cst_21 : f32 to vector<2x64xf32>
    %40 = arith.mulf %38, %39 : vector<2x64xf32>
    %c0_22 = arith.constant 0 : index
    %c0_23 = arith.constant 0 : index
    %c0_24 = arith.constant 0 : index
    %41 = vector.load %arg9[%c0_22, %c0_23, %c0_24] : memref<1x2x64xf32, #tpu.memory_space<vmem>>, vector<1x2x64xf32>
    %42 = vector.shape_cast %41 : vector<1x2x64xf32> to vector<2x64xf32>
    %43 = vector.shape_cast %40 : vector<2x64xf32> to vector<1x2x64xf32>
    tpu.vector_store %arg9[%c0_22, %c0_23, %c0_24], %43 {strides = array<i32>} : memref<1x2x64xf32, #tpu.memory_space<vmem>>, vector<1x2x64xf32>,
    return
  }
  func.func @transform_0(%arg0: i32, %arg1: i32) -> (i32, i32, i32) {
    %c0_i32 = arith.constant 0 : i32
    %c0_i32_0 = arith.constant 0 : i32
    return %arg0, %c0_i32, %arg1 : i32, i32, i32
  }
  func.func @transform_1(%arg0: i32, %arg1: i32) -> (i32, i32) {
    %c0_i32 = arith.constant 0 : i32
    %c0_i32_0 = arith.constant 0 : i32
    %c0_i32_1 = arith.constant 0 : i32
    return %c0_i32, %c0_i32_0 : i32, i32
  }
  func.func @transform_2(%arg0: i32, %arg1: i32) -> (i32, i32) {
    %c0_i32 = arith.constant 0 : i32
    %c0_i32_0 = arith.constant 0 : i32
    %c0_i32_1 = arith.constant 0 : i32
    return %c0_i32, %c0_i32_0 : i32, i32
  }
  func.func @transform_3(%arg0: i32, %arg1: i32) -> (i32, i32) {
    %c0_i32 = arith.constant 0 : i32
    %c0_i32_0 = arith.constant 0 : i32
    %c0_i32_1 = arith.constant 0 : i32
    return %c0_i32, %c0_i32_0 : i32, i32
  }
  func.func @transform_4(%arg0: i32, %arg1: i32) -> (i32, i32) {
    %c0_i32 = arith.constant 0 : i32
    %c0_i32_0 = arith.constant 0 : i32
    %c0_i32_1 = arith.constant 0 : i32
    return %c0_i32, %c0_i32_0 : i32, i32
  }
  func.func @transform_5(%arg0: i32, %arg1: i32) -> (i32, i32) {
    %c0_i32 = arith.constant 0 : i32
    %c0_i32_0 = arith.constant 0 : i32
    %c0_i32_1 = arith.constant 0 : i32
    return %c0_i32, %c0_i32_0 : i32, i32
  }
  func.func @transform_6(%arg0: i32, %arg1: i32) -> (i32, i32) {
    %c0_i32 = arith.constant 0 : i32
    %c0_i32_0 = arith.constant 0 : i32
    %c0_i32_1 = arith.constant 0 : i32
    return %c0_i32, %c0_i32_0 : i32, i32
  }
  func.func @transform_7(%arg0: i32, %arg1: i32) -> (i32, i32, i32) {
    %c0_i32 = arith.constant 0 : i32
    %c0_i32_0 = arith.constant 0 : i32
    return %arg0, %c0_i32, %arg1 : i32, i32, i32
  }
}

</mosaic_0001>

<bundles_post_ra>
// kernel: tpu_custom_call.1
= control target key start
LH: loop header
LB: loop body
LE: loop exit
PB: predicated region body
PF: predicated region fallthrough
CT: control target
= control target key end

     0   :  { %12 = vsyncpa [#allocation3], 0  ;;  %s940_s0 = inlined_call_operand.vmem [shape: f32[2,4,64], index: 0, kind: input, shape index: {}]   ;;  %s941_s1 = inlined_call_operand.vmem [shape: f32[4,1], index: 1, kind: input, shape index: {}]   ;;  %s942_s2 = inlined_call_operand.vmem [shape: f32[4,1], index: 2, kind: input, shape index: {}]   ;;  %s943_s3 = inlined_call_operand.vmem [shape: f32[8,4], index: 3, kind: input, shape index: {}]   ;;  %s944_s4 = inlined_call_operand.vmem [shape: f32[8,1], index: 4, kind: input, shape index: {}]   ;;  %s945_s5 = inlined_call_operand.vmem [shape: f32[2,8], index: 5, kind: input, shape index: {}]   ;;  %s946_s6 = inlined_call_operand.vmem [shape: f32[2,1], index: 6, kind: input, shape index: {}]   ;;  %s947_s7 = inlined_call_operand.hbm [shape: f32[2,2,64], index: 7, kind: output, shape index: {}]  }
   0x1   :  { %14 = vsyncpa [#allocation3 + $0x1], 0  ;;  %s810_s24 = smov 0   ;;  %s812_s25 = smov 0  }
   0x2   :  { %s814_s26 = smov 0   ;;  %s816_s27 = smov 0  }
   0x3   :  { %s818_s28 = smov 0   ;;  %s820_s29 = smov 0  }
   0x4 LB: > { %s594_s30 = sadd.s32 4294967295, %s764_s29   ;;  %s595_s8 = sadd.s32 4294967294, %s764_s29   ;;  %s764_s29 = sphi %s820_s29, %s20_s29   ;;  %s760_s28 = sphi %s818_s28, %s954_s28   ;;  %s756_s27 = sphi %s816_s27, %s953_s27   ;;  %s752_s26 = sphi %s814_s26, %s952_s26   ;;  %s748_s25 = sphi %s812_s25, %s951_s25   ;;  %s744_s24 = sphi %s810_s24, %s950_s24  }
   0x5   : > { %s32_s9 = sadd.s32 1, %s760_s28  ;;  %s195_s10 = sadd.s32 1, %s752_s26 }
   0x6   : > { %p34_p0 = scmp.ge.s32.totalorder %s32_s9, 2  ;;  %p205_p1 = scmp.ne.s32.totalorder %s752_s26, %s748_s25 }
   0x7   : > { %p206_p2 = scmp.eq.s32.totalorder %s594_s30, 1  ;;  %p211_p3 = scmp.ne.s32.totalorder %s748_s25, %s744_s24 }
   0x8   : > { %s956_s9 = smov (%p34_p0, %s32_s9), 0  ;;  %p212_p5 = scmp.eq.s32.totalorder %s595_s8, 1 }
   0x9   : > { %p850_p4 = por %p206_p2, %p205_p1  ;;  %s190_s12 = ssub.s32 %s760_s28, %s956_s9 }
   0xa   : > { %p598_p6 = scmp.ge.s32.totalorder %s764_s29, 1  ;;  %p193_p7 = scmp.eq.s32.totalorder %s190_s12, 0 }
   0xb   : > { %p857_p8 = por %p212_p5, %p211_p3  ;;  %p258_p9 = scmp.lt.s32.totalorder %s764_s29, 3 }
   0xc   : > { %s863_s14 = scalar_select %p193_p7, %s752_s26, %s195_s10  }
   0xd   : > { %p259_p10 = pnand %p598_p6, %p258_p9 }
   0xe   : > { %v323_v0 = vld [vmem:[%s941_s1] sm:$0xf] (!%p259_p10)  ;;  %v766_v1 = vmov (!%p259_p10), 0   ;;  %v767_v3 = vmov (!%p259_p10), 0.0   ;;  %vm768_vm0 = vmmov (!%p259_p10), 0   ;;  %p292_p11 = scmp.lt.s32.totalorder (!%p259_p10), %s756_s27, 1 }
   0xf   : > { %262 = sbr.rel (%p259_p10) target bundleno = 609 (0x261), region = 48  ;;  %680 = vset.pattern.permute.xlu0 (!%p259_p10), %v766_v1  ;;  %681 = vset.pattern.permute.xlu1 (!%p259_p10), %v766_v1  ;;  %v330_v2 = vld [vmem:[%s942_s2] sm:$0xf] (!%p259_p10)  ;;  %vm300_vm1 = vcmask (!%p259_p10), 519168   ;;  %vm348_vm2 = vcmask (!%p259_p10), 1043456   ;;  %vm344_vm3 = vcmask (!%p259_p10), 31744  }
  0x10   : > { %326 = vperm.xlu0 (!%p259_p10), %680, %v323_v0   ;;  %612 = vmatprep.subr.mxu0 (!%p259_p10), %v767_v3  ;;  %v338_v4 = vld [vmem:[%s944_s4] sm:$0xff] (!%p259_p10)  ;;  %vm430_vm4 = vcmask (!%p259_p10), 64512   ;;  %s289_s19 = sand.u32 (!%p259_p10), 1, %s748_s25   ;;  %s605_s21 = sshll.u32 (!%p259_p10), %s756_s27, 5  ;;  %vm506_vm5 = vcmask (!%p259_p10), 517120  }
  0x11   : > { %617 = vmatprep.subr.mxu1 (!%p259_p10), %v767_v3  ;;  %614 = vmatprep.mubr.msk.f32.mxu0 (!%p259_p10), %vm768_vm0, %v767_v3  ;;  %v424_v5 = vld [vmem:[%s946_s6] sm:$0x3] (!%p259_p10)  ;;  %s599_s20 = sshll.u32 (!%p259_p10), %s289_s19, 1  ;;  %s893_s10 = scalar_lea.hbm (!%p259_p10), %s947_s7, %s605_s21 }
  0x12   : > { %619 = vmatprep.mubr.msk.f32.mxu1 (!%p259_p10), %vm768_vm0, %v767_v3  ;;  %341 = vperm.xlu1 (!%p259_p10), %681, %v338_v4   ;;  %v337_v32 = vld [vmem:[%s943_s3] sm:$0xff] (!%p259_p10)  ;;  %s291_s22 = scalar_lea.vmem (!%p259_p10), [#allocation2], %s599_s20 }
  0x13   : > { %v423_v38 = vld [vmem:[%s945_s5] sm:$0x3] (!%p259_p10) }
  0x14   : > { %333 = vperm.xlu0 (!%p259_p10), %680, %v330_v2  }
  0x16   : > { %427 = vperm.xlu1 %681, %v424_v5   ;;  %s293_s23 = scalar_select %p292_p11, %s756_s27, 1 }
  0x17   : > { %s769_s27 = smov [#allocation2]  }
  0x18   : > { %s600_s30 = sshll.u32 %s293_s23, 2  ;;  %s523_s23 = sshll.u32 %s291_s22, 4  ;;  %s895_s23 = int_to_ptr.vmem [resolvable:$true] %s523_s23 }
  0x19   : > { %s298_s12 = scalar_lea.vmem %s940_s0, %s600_s30  ;;  %s686_s15 = scalar_lea.vmem %s895_s23, 32 }
  0x1a   : > { %v299_v6 = vld [vmem:[%s298_s12] sm:$0xf]  ;;  %s509_s12 = scalar_lea.sflag [#allocation3], %s289_s19  ;;  %p687_p12 = scmp.ne.s32.totalorder %s895_s23, %s686_s15 }
  0x1b   : > { %v301_v7 = vsel %vm300_vm1, %v299_v6, 0.0  ;;  %s690_s16 = sshll.u32 %s769_s27, 4  ;;  %s691_s16 = int_to_ptr.vmem [resolvable:$false] %s690_s16 }
  0x1c   : > { %v302_v8 = vrot.slane %v301_v7, 4  ;;  %p688_p13 = pnand %p687_p12, %p850_p4  ;;  %s692_s17 = scalar_lea.vmem %s691_s16, 64 }
  0x1d   : > { %p693_p1 = scmp.lt.s32.totalorder %s895_s23, %s691_s16  ;;  %p694_p2 = scmp.lt.s32.totalorder %s692_s17, %s686_s15 }
  0x1e   : > { %v303_v9 = vadd.f32 %v302_v8, %v301_v7  ;;  %p689_p0 = pneg %p688_p13 }
  0x1f   : > { %p695_p3 = por %p694_p2, %p693_p1 }
  0x20   : > { %v304_v10 = vrot.slane %v303_v9, 2 }
  0x21   : > { %p696_p5 = pnand %p695_p3, %p689_p0 }
  0x22   : > { %v305_v11 = vadd.f32 %v304_v10, %v303_v9 }
  0x24   : > { %v306_v12 = vrot.slane %v305_v11, 1 }
  0x26   : > { %v307_v13 = vadd.f32 %v306_v12, %v305_v11 }
  0x28   : > { %v309_v14 = vmul.f32 0.25, %v307_v13 }
  0x2a   : > { %v310_v15 = vsub.f32 %v299_v6, %v309_v14 }
  0x2c   : > { %v311_v16 = vmul.f32 %v310_v15, %v310_v15 }
  0x2e   : > { %v312_v17 = vsel %vm300_vm1, %v311_v16, 0.0 }
  0x2f   : > { %v313_v18 = vrot.slane %v312_v17, 4 }
  0x31   : > { %v314_v19 = vadd.f32 %v313_v18, %v312_v17 }
  0x33   : > { %v315_v20 = vrot.slane %v314_v19, 2 }
  0x35   : > { %v316_v21 = vadd.f32 %v315_v20, %v314_v19 }
  0x37   : > { %v317_v22 = vrot.slane %v316_v21, 1 }
  0x39   : > { %v318_v23 = vadd.f32 %v317_v22, %v316_v21 }
  0x3b   : > { %v319_v24 = vmul.f32 0.25, %v318_v23 }
  0x3d   : > { %v320_v25 = vadd.f32 1e-05, %v319_v24 }
  0x3f   : > { %682 = vrsqrt.f32 %v320_v25 }
  0x49   : > { %v683_v26 = vpop.eup %682 }
  0x4a   : > { %v322_v27 = vmul.f32 %v683_v26, %v310_v15 }
  0x8f   : > { %v327_v28 = vpop.permute.xlu0 %326 }
  0x90   : > { %v329_v29 = vmul.f32 %v327_v28, %v322_v27 }
  0x91   : > { %v342_v33 = vpop.permute.xlu1 %341 }
  0x93   : > { %v334_v30 = vpop.permute.xlu0 %333 }
  0x94   : > { %v336_v31 = vadd.f32 %v334_v30, %v329_v29 }
  0x95   : > { %v428_v39 = vpop.permute.xlu1 %427 }
  0x96   : > { %613 = vmatpush3.msk.msra.mxu0 %vm348_vm2, %v336_v31 }
  0x97   : > { %615 = vmatmul.mubr.msk.f32.vlgmr.msra.gmra.mrb[0].mxu0 %vm344_vm3, %v337_v32 }
 0x16a   : > { %v418_v34 = vpop.f32.mrb[0].mxu0 }
 0x16b   : > { %v419_v35 = vadd.f32 %v418_v34, %v342_v33  ;;  %v616_v36 = vpop.f32.mrb[1].mxu0 }
 0x16d   : > { %v422_v37 = vmax.f32 %v419_v35, 0.0 }
 0x16f   : > { %618 = vmatpush3.msra.mxu1 %v422_v37 }
 0x170   : > { %620 = vmatmul.mubr.msk.f32.vlgmr.msra.gmra.mrb[0].mxu1 %vm430_vm4, %v423_v38 }
 0x243   : > { %v500_v40 = vpop.f32.mrb[0].mxu1 }
 0x244   : > { %v501_v41 = vadd.f32 %v500_v40, %v428_v39  ;;  %v621_v42 = vpop.f32.mrb[1].mxu1 }
 0x246   : > { %684 = vtanh.f32 %v501_v41 }
 0x250   : > { %v685_v43 = vpop.eup %684 }
 0x251   : > { %v505_v44 = vmul.f32 5.0, %v685_v43 }
 0x253   : > { %507 = vst.msk [vmem:[%s291_s22] sm:$0x3] %vm506_vm5, %v505_v44 }
 0x254   : > { %699 = shalt.err (!%p696_p5)
}
 0x255   : > { %s700_s18 = scalar_lea.hbm %s893_s10, 32  ;;  %s704_s21 = scalar_lea.hbm %s947_s7, 64 }
 0x256   : > { %p701_p6 = scmp.ne.s32.totalorder %s893_s10, %s700_s18  ;;  %p705_p10 = scmp.lt.u32.totalorder %s893_s10, %s947_s7 }
 0x257   : > { %p706_p11 = scmp.lt.u32.totalorder %s704_s21, %s700_s18  ;;  %p708_p13 = scmp.lt.u32.totalorder %s700_s18, %s893_s10 }
 0x258   : > { %p702_p7 = pnand %p701_p6, %p850_p4 }
 0x259   : > { %p707_p12 = por %p706_p11, %p705_p10 }
 0x25a   : > { %p703_p9 = pneg %p702_p7 }
 0x25b   : > { %p709_p0 = por %p708_p13, %p707_p12 }
 0x25d   : > { %p710_p1 = pnand %p709_p0, %p703_p9 }
 0x25f   : > { %713 = shalt.err (!%p710_p1)
}
 0x260   : > { %622 = dma.vmem_to_hbm [thread:$0]  (%p850_p4), %s895_s23, 32, %s893_s10, %s509_s12  }
 0x261 PF: > { %p628_p2 = scmp.ge.s32.totalorder %s764_s29, 2  ;;  %s535_s8 = sand.u32 1, %s744_s24  }
 0x262   : > { %s536_s15 = scalar_lea.sflag [#allocation3], %s535_s8 }
 0x263   : > { %p625_p3 = pnand %p628_p2, %p857_p8 }
 0x265   : > { %739 = dma.done.wait (!%p625_p3), %s536_s15, 32  }
 0x266   : > { %741 = vsyncadd (!%p625_p3), %s536_s15, 4294967264  ;;  %s20_s29 = sadd.s32 1, %s764_s29   ;;  %s950_s24 = smov %s748_s25 }
 0x267   : > { %p17_p5 = scmp.ge.s32.totalorder %s20_s29, 4   ;;  %s951_s25 = smov %s752_s26 }
 0x268   : > { %s952_s26 = smov %s863_s14  ;;  %s953_s27 = smov %s760_s28 }
 0x269   : > { %s954_s28 = smov %s956_s9  ;;  %19 = sbr.rel (!%p17_p5) target bundleno = 4 (0x4), region = 83 }
 0x270   :  { %541 = vsyncpa [#allocation3], 1 }
 0x271   :  { %543 = vsyncpa [#allocation3 + $0x1], 1 }

</bundles_post_ra>
